<compile_context>
chip_gen: v7x
topology: tpu7x:2x2x1
jax: 0.10.0
libtpu: 0.0.40
codegen_flags: <defaults>
</compile_context>

<pallas_src>
import functools
import math
from typing import NamedTuple, Optional

import jax
import jax.numpy as jnp
from jax.experimental import pallas as pl
from jax.experimental.pallas import tpu as pltpu


# ----------------------------------------------------------------------------
# Kernel body
# ----------------------------------------------------------------------------
def _mlp_kernel(x_ref, wgu_ref, wd_ref, o_ref, acc_ref, *, ti):
    # x_ref  : (tm, H)        activation row tile (resident across i)
    # wgu_ref: (H, 2*ti)      interleaved [gate_i | up_i] weight slab
    # wd_ref : (ti, H)        down-projection weight slab
    # o_ref  : (tm, H)        output tile (resident across i)
    # acc_ref: (tm, H) f32    accumulator scratch
    @pl.when(pl.program_id(1) == 0)
    def _():
        acc_ref[...] = jnp.zeros_like(acc_ref)

    # Single MXU pass for gate+up: (tm, H) @ (H, 2*ti) -> (tm, 2*ti), f32 acc.
    gu = jnp.dot(x_ref[...], wgu_ref[...], preferred_element_type=jnp.float32)
    g = gu[:, :ti]                      # static, 128-aligned slices
    u = gu[:, ti:]
    h = (g * jax.nn.sigmoid(g)) * u     # silu(g) * u, f32

    # Partial down projection, accumulated over intermediate slabs.
    acc_ref[...] += jnp.dot(
        h.astype(wd_ref.dtype), wd_ref[...], preferred_element_type=jnp.float32
    )

    @pl.when(pl.program_id(1) == pl.num_programs(1) - 1)
    def _():
        o_ref[...] = acc_ref[...].astype(o_ref.dtype)


# ----------------------------------------------------------------------------
# Helpers: tile sizing / VMEM budgeting
# ----------------------------------------------------------------------------
def _round_up(a, b):
    return (a + b - 1) // b * b


def _vmem_capacity_bytes():
    try:
        return int(pltpu.get_tpu_info().vmem_capacity_bytes)
    except Exception:
        return 64 << 20  # conservative default (v7x per-TensorCore)


def _vmem_need_bytes(tm, ti, H, bytes_per_el):
    dbl = 2  # double-buffered pipeline stages
    x_tile = tm * H * bytes_per_el * dbl
    wgu_tile = H * 2 * ti * bytes_per_el * dbl
    wd_tile = ti * H * bytes_per_el * dbl
    out_tile = tm * H * bytes_per_el * dbl
    acc = tm * H * 4
    temps = tm * 2 * ti * 4 * 2  # gu + g/u/h f32 temporaries (rough)
    return x_tile + wgu_tile + wd_tile + out_tile + acc + temps


def _choose_ti(H, I, bytes_per_el, vmem_cap):
    budget = int(vmem_cap * 0.75)
    cands = [t for t in (512, 256, 128) if I % t == 0]
    if not cands:
        cands = sorted(
            {min(512, _round_up(I, 128)), min(256, _round_up(I, 128)), 128},
            reverse=True,
        )
    for ti in cands:
        # keep the double-buffered weight slabs well under the budget
        w_bytes = (H * 2 * ti + ti * H) * bytes_per_el * 2
        if w_bytes <= 0.6 * budget:
            return ti
    return cands[-1]


def _choose_tm(M, H, ti, bytes_per_el, vmem_cap):
    budget = int(vmem_cap * 0.75)
    sublane = 16 if bytes_per_el == 2 else 8
    tm_upper = _round_up(max(M, 1), sublane)
    for tm in (512, 256, 128, 64, 32, 16, 8):
        tm = min(tm, tm_upper)
        if _vmem_need_bytes(tm, ti, H, bytes_per_el) <= budget:
            return tm
    return min(8, tm_upper)


# ----------------------------------------------------------------------------
# One-time weight preparation (hoisted out of the per-call forward path)
# ----------------------------------------------------------------------------
class PreparedLlamaMLP(NamedTuple):
    wgu: jax.Array          # (H, 2*Ip), per-slab interleaved [gate_i | up_i]
    wd_t: jax.Array         # (Ip, H)
    ti: int                 # intermediate tile width (multiple of 128)
    hidden_size: int        # H
    intermediate_size: int  # true I (before padding)


def make_llama_mlp_weights(wg, wu, wd, *, param_dtype=jnp.bfloat16, ti=None):
    """Transpose / pad / cast / gate-up interleave the weights ONCE.

    wg, wu: (I, H)   PyTorch nn.Linear layout (out_features, in_features)
    wd    : (H, I)
    """
    I, H = wg.shape
    assert wu.shape == (I, H) and wd.shape == (H, I)
    bytes_per_el = jnp.dtype(param_dtype).itemsize
    if ti is None:
        ti = _choose_ti(H, I, bytes_per_el, _vmem_capacity_bytes())
    Ip = _round_up(I, ti)

    wg_t = wg.astype(param_dtype).T   # (H, I)
    wu_t = wu.astype(param_dtype).T   # (H, I)
    wd_t = wd.astype(param_dtype).T   # (I, H)
    if Ip != I:
        # Zero-padded intermediate columns/rows contribute exactly 0 to output.
        wg_t = jnp.pad(wg_t, ((0, 0), (0, Ip - I)))
        wu_t = jnp.pad(wu_t, ((0, 0), (0, Ip - I)))
        wd_t = jnp.pad(wd_t, ((0, Ip - I), (0, 0)))

    n_i = Ip // ti
    # Interleave per intermediate slab so block i of width 2*ti == [gate_i|up_i].
    wgu = jnp.concatenate(
        [wg_t.reshape(H, n_i, ti), wu_t.reshape(H, n_i, ti)], axis=2
    ).reshape(H, 2 * Ip)

    return PreparedLlamaMLP(wgu=wgu, wd_t=wd_t, ti=ti,
                            hidden_size=H, intermediate_size=I)


# ----------------------------------------------------------------------------
# Forward pass
# ----------------------------------------------------------------------------
def llama_mlp(x, prep: PreparedLlamaMLP, *, tm: Optional[int] = None):
    """Fused LlamaMLP forward:  down( silu(gate(x)) * up(x) ).

    x: (..., H).  Weights must have been prepared via make_llama_mlp_weights.
    """
    orig_shape = x.shape
    orig_dtype = x.dtype
    H = prep.hidden_size
    assert orig_shape[-1] == H
    M = math.prod(orig_shape[:-1]) if len(orig_shape) > 1 else 1

    ti = prep.ti
    Ip = prep.wd_t.shape[0]
    param_dtype = prep.wgu.dtype
    bytes_per_el = jnp.dtype(param_dtype).itemsize
    vmem_cap = _vmem_capacity_bytes()
    if tm is None:
        tm = _choose_tm(M, H, ti, bytes_per_el, vmem_cap)

    x2 = x.reshape(M, H).astype(param_dtype)
    Mp = _round_up(M, tm)
    if Mp != M:
        x2 = jnp.pad(x2, ((0, Mp - M), (0, 0)))

    grid = (Mp // tm, Ip // ti)

    need = _vmem_need_bytes(tm, ti, H, bytes_per_el)
    vmem_limit = min(int(vmem_cap * 0.9), max(32 << 20, int(need * 1.5)))

    cost = pl.CostEstimate(
        flops=6 * M * H * Ip,                 # three M x H x I matmuls
        transcendentals=M * Ip,               # sigmoid in silu
        bytes_accessed=(3 * H * Ip) * bytes_per_el + 2 * M * H * bytes_per_el,
    )

    out = pl.pallas_call(
        functools.partial(_mlp_kernel, ti=ti),
        out_shape=jax.ShapeDtypeStruct((Mp, H), orig_dtype),
        grid_spec=pltpu.PrefetchScalarGridSpec(
            num_scalar_prefetch=0,
            grid=grid,
            in_specs=[
                pl.BlockSpec((tm, H), lambda m, i: (m, 0)),        # x row tile
                pl.BlockSpec((H, 2 * ti), lambda m, i: (0, i)),    # [gate|up] slab
                pl.BlockSpec((ti, H), lambda m, i: (i, 0)),        # down slab
            ],
            out_specs=pl.BlockSpec((tm, H), lambda m, i: (m, 0)),
            scratch_shapes=[pltpu.VMEM((tm, H), jnp.float32)],
        ),
        compiler_params=pltpu.CompilerParams(
            # m axis is independent (megacore-shardable); i axis is the
            # reduction over the resident accumulator -> must be "arbitrary".
            dimension_semantics=("parallel", "arbitrary"),
            vmem_limit_bytes=vmem_limit,
        ),
        cost_estimate=cost,
    )(x2, prep.wgu, prep.wd_t)

    if Mp != M:
        out = out[:M]
    return out.reshape(orig_shape)


# ----------------------------------------------------------------------------
# Demo / correctness check
# ----------------------------------------------------------------------------
if __name__ == "__main__":
    batch, seq = 2, 8
    hidden, intermediate = 256, 512

    key = jax.random.PRNGKey(0)
    kx, kg, ku, kd = jax.random.split(key, 4)
    scale = 0.05
    x = jax.random.normal(kx, (batch, seq, hidden), dtype=jnp.float32)
    wg = scale * jax.random.normal(kg, (intermediate, hidden), dtype=jnp.float32)
    wu = scale * jax.random.normal(ku, (intermediate, hidden), dtype=jnp.float32)
    wd = scale * jax.random.normal(kd, (hidden, intermediate), dtype=jnp.float32)

    # One-time weight prep (transpose / cast to bf16 / gate-up interleave).
    prep = make_llama_mlp_weights(wg, wu, wd, param_dtype=jnp.bfloat16)

    y = llama_mlp(x, prep)
    jax.block_until_ready(y)

    # Pure-JAX reference with matching precision (bf16 operands, f32 accum).
    xb = x.reshape(-1, hidden).astype(jnp.bfloat16)
    wgb = wg.astype(jnp.bfloat16)
    wub = wu.astype(jnp.bfloat16)
    wdb = wd.astype(jnp.bfloat16)
    g = jnp.dot(xb, wgb.T, preferred_element_type=jnp.float32)
    u = jnp.dot(xb, wub.T, preferred_element_type=jnp.float32)
    h = ((g * jax.nn.sigmoid(g)) * u).astype(jnp.bfloat16)
    ref = jnp.dot(h, wdb.T, preferred_element_type=jnp.float32)
    ref = ref.reshape(batch, seq, hidden).astype(jnp.float32)

    max_err = float(jnp.max(jnp.abs(y.astype(jnp.float32) - ref)))
    assert jnp.allclose(y.astype(jnp.float32), ref, atol=1e-2, rtol=1e-2), (
        f"mismatch vs reference: max abs diff = {max_err}"
    )

    print("KERNEL_OK")
</pallas_src>

<mosaic_0001>
module attributes {stable_mosaic.version = 11 : i64} {
  func.func @_mlp_kernel(%arg0: i32, %arg1: i32, %arg2: memref<16x256xbf16, #tpu.memory_space<vmem>>, %arg3: memref<256x1024xbf16, #tpu.memory_space<vmem>>, %arg4: memref<512x256xbf16, #tpu.memory_space<vmem>>, %arg5: memref<16x256xf32, #tpu.memory_space<vmem>>, %arg6: memref<16x256xf32, #tpu.memory_space<vmem>>) attributes {dimension_semantics = [#tpu.dimension_semantics<parallel>, #tpu.dimension_semantics<arbitrary>], iteration_bounds = array<i64: 1, 1>, scalar_prefetch = 0 : i64, scratch_operands = 1 : i64, tpu.core_type = #tpu.core_type<tc>, window_params = [{transform_indices = @transform_0, window_bounds = array<i64: 16, 256>}, {transform_indices = @transform_1, window_bounds = array<i64: 256, 1024>}, {transform_indices = @transform_2, window_bounds = array<i64: 512, 256>}, {transform_indices = @transform_3, window_bounds = array<i64: 16, 256>}]} {
    %c0_i32 = arith.constant 0 : i32
    %0 = arith.cmpi eq, %arg1, %c0_i32 : i32
    %1 = arith.extui %0 : i1 to i32
    %c0_i32_0 = arith.constant 0 : i32
    %2 = arith.cmpi ne, %1, %c0_i32_0 : i32
    scf.if %2 {
      %cst_14 = arith.constant 0.000000e+00 : f32
      %24 = vector.broadcast %cst_14 : f32 to vector<16x256xf32>
      %c0_15 = arith.constant 0 : index
      %c0_16 = arith.constant 0 : index
      %25 = vector.load %arg6[%c0_15, %c0_16] : memref<16x256xf32, #tpu.memory_space<vmem>>, vector<16x256xf32>
      tpu.vector_store %arg6[%c0_15, %c0_16], %24 {strides = array<i32>} : memref<16x256xf32, #tpu.memory_space<vmem>>, vector<16x256xf32>,
    } else {
    }
    %c0 = arith.constant 0 : index
    %c0_1 = arith.constant 0 : index
    %3 = vector.load %arg2[%c0, %c0_1] : memref<16x256xbf16, #tpu.memory_space<vmem>>, vector<16x256xbf16>
    %c0_2 = arith.constant 0 : index
    %c0_3 = arith.constant 0 : index
    %4 = vector.load %arg3[%c0_2, %c0_3] : memref<256x1024xbf16, #tpu.memory_space<vmem>>, vector<256x1024xbf16>
    %cst = arith.constant dense<0.000000e+00> : vector<16x1024xf32>
    %5 = tpu.matmul %3, %4, %cst {dimension_numbers = #tpu.dot_dimension_numbers<[1], [0], [0], [1], [0, 0, 1, 1], [], []>} : vector<16x256xbf16>, vector<256x1024xbf16>, vector<16x1024xf32> -> vector<16x1024xf32>
    %6 = vector.extract_strided_slice %5 {offsets = [0, 0], sizes = [16, 512], strides = [1, 1]} : vector<16x1024xf32> to vector<16x512xf32>
    %7 = vector.extract_strided_slice %5 {offsets = [0, 512], sizes = [16, 512], strides = [1, 1]} : vector<16x1024xf32> to vector<16x512xf32>
    %8 = arith.negf %6 : vector<16x512xf32>
    %9 = math.exp %8 : vector<16x512xf32>
    %cst_4 = arith.constant 1.000000e+00 : f32
    %10 = vector.broadcast %cst_4 : f32 to vector<16x512xf32>
    %11 = arith.addf %10, %9 : vector<16x512xf32>
    %12 = arith.divf %10, %11 : vector<16x512xf32>
    %13 = arith.mulf %6, %12 : vector<16x512xf32>
    %14 = arith.mulf %13, %7 : vector<16x512xf32>
    %c0_5 = arith.constant 0 : index
    %c0_6 = arith.constant 0 : index
    %15 = vector.load %arg6[%c0_5, %c0_6] : memref<16x256xf32, #tpu.memory_space<vmem>>, vector<16x256xf32>
    %16 = arith.truncf %14 : vector<16x512xf32> to vector<16x512xbf16>
    %c0_7 = arith.constant 0 : index
    %c0_8 = arith.constant 0 : index
    %17 = vector.load %arg4[%c0_7, %c0_8] : memref<512x256xbf16, #tpu.memory_space<vmem>>, vector<512x256xbf16>
    %cst_9 = arith.constant dense<0.000000e+00> : vector<16x256xf32>
    %18 = tpu.matmul %16, %17, %cst_9 {dimension_numbers = #tpu.dot_dimension_numbers<[1], [0], [0], [1], [0, 0, 1, 1], [], []>} : vector<16x512xbf16>, vector<512x256xbf16>, vector<16x256xf32> -> vector<16x256xf32>
    %19 = arith.addf %15, %18 : vector<16x256xf32>
    %c0_10 = arith.constant 0 : index
    %c0_11 = arith.constant 0 : index
    %20 = vector.load %arg6[%c0_10, %c0_11] : memref<16x256xf32, #tpu.memory_space<vmem>>, vector<16x256xf32>
    tpu.vector_store %arg6[%c0_10, %c0_11], %19 {strides = array<i32>} : memref<16x256xf32, #tpu.memory_space<vmem>>, vector<16x256xf32>,
    %c0_i32_12 = arith.constant 0 : i32
    %21 = arith.cmpi eq, %arg1, %c0_i32_12 : i32
    %22 = arith.extui %21 : i1 to i32
    %c0_i32_13 = arith.constant 0 : i32
    %23 = arith.cmpi ne, %22, %c0_i32_13 : i32
    scf.if %23 {
      %c0_14 = arith.constant 0 : index
      %c0_15 = arith.constant 0 : index
      %24 = vector.load %arg6[%c0_14, %c0_15] : memref<16x256xf32, #tpu.memory_space<vmem>>, vector<16x256xf32>
      %c0_16 = arith.constant 0 : index
      %c0_17 = arith.constant 0 : index
      %25 = vector.load %arg5[%c0_16, %c0_17] : memref<16x256xf32, #tpu.memory_space<vmem>>, vector<16x256xf32>
      tpu.vector_store %arg5[%c0_16, %c0_17], %24 {strides = array<i32>} : memref<16x256xf32, #tpu.memory_space<vmem>>, vector<16x256xf32>,
    } else {
    }
    return
  }
  func.func @transform_0(%arg0: i32, %arg1: i32) -> (i32, i32) {
    %c0_i32 = arith.constant 0 : i32
    %c0_i32_0 = arith.constant 0 : i32
    return %arg0, %c0_i32 : i32, i32
  }
  func.func @transform_1(%arg0: i32, %arg1: i32) -> (i32, i32) {
    %c0_i32 = arith.constant 0 : i32
    %c0_i32_0 = arith.constant 0 : i32
    return %c0_i32, %arg1 : i32, i32
  }
  func.func @transform_2(%arg0: i32, %arg1: i32) -> (i32, i32) {
    %c0_i32 = arith.constant 0 : i32
    %c0_i32_0 = arith.constant 0 : i32
    return %arg1, %c0_i32 : i32, i32
  }
  func.func @transform_3(%arg0: i32, %arg1: i32) -> (i32, i32) {
    %c0_i32 = arith.constant 0 : i32
    %c0_i32_0 = arith.constant 0 : i32
    return %arg0, %c0_i32 : i32, i32
  }
}

</mosaic_0001>

<bundles_post_ra>
// kernel: tpu_custom_call.1
= control target key start
LH: loop header
LB: loop body
LE: loop exit
PB: predicated region body
PF: predicated region fallthrough
CT: control target
= control target key end

     0   :  { %8 = vsyncpa [#allocation4], 0  ;;  %s2126_s0 = inlined_call_operand.hbm [shape: bf16[16,256], index: 0, kind: input, shape index: {}]   ;;  %s2127_s1 = inlined_call_operand.hbm [shape: bf16[256,1024], index: 1, kind: input, shape index: {}]   ;;  %s2128_s2 = inlined_call_operand.hbm [shape: bf16[512,256], index: 2, kind: input, shape index: {}]   ;;  %s2129_s3 = inlined_call_operand.hbm [shape: f32[16,256], index: 3, kind: output, shape index: {}]  }
   0x1   :  { %9 = vsyncpa [#allocation7], 0 }
   0x2   :  { %10 = vsyncpa [#allocation5], 0  ;;  %s2036_s12 = smov [#allocation6]   ;;  %s1942_s16 = scalar_lea.hbm %s2127_s1, 16384 }
   0x3   :  { %s28_s13 = sshll.u32 %s2036_s12, 4  ;;  %p1943_p0 = scmp.ne.s32.totalorder %s2127_s1, %s1942_s16  ;;  %s29_s13 = int_to_ptr.vmem [resolvable:$true] %s28_s13 }
   0x4   :  { %p1946_p1 = scmp.lt.u32.totalorder %s1942_s16, %s2127_s1 }
   0x6   :  { %p1948_p2 = pnand %p1946_p1, %p1943_p0 }
   0x8   :  { %1951 = shalt.err (!%p1948_p2)
}
   0x9   :  { %s1952_s21 = scalar_lea.vmem %s29_s13, 16384  ;;  %p1957_p4 = scmp.lt.s32.totalorder %s29_s13, %s29_s13 }
   0xa   :  { %p1953_p3 = scmp.ne.s32.totalorder %s29_s13, %s1952_s21  ;;  %p1958_p5 = scmp.lt.s32.totalorder %s1952_s21, %s1952_s21 }
   0xc   :  { %p1959_p6 = por %p1958_p5, %p1957_p4 }
   0xe   :  { %p1960_p7 = pnand %p1959_p6, %p1953_p3 }
  0x10   :  { %1963 = shalt.err (!%p1960_p7)
}
  0x11   :  { %s2037_s22 = smov 512   ;;  %s2038_s23 = smov 32  }
  0x12   :  { %34 = dma.hbm_to_vmem [thread:$0]  %s2127_s1, 16384, %s29_s13, [#allocation7], %s2037_s22, %s2037_s22, %s2038_s23  }
  0x13   :  { %s2039_s26 = smov [#allocation3]   ;;  %s1964_s30 = scalar_lea.hbm %s2126_s0, 256 }
  0x14   :  { %s16_s27 = sshll.u32 %s2039_s26, 4  ;;  %p1965_p8 = scmp.ne.s32.totalorder %s2126_s0, %s1964_s30  ;;  %s17_s27 = int_to_ptr.vmem [resolvable:$true] %s16_s27 }
  0x15   :  { %p1968_p9 = scmp.lt.u32.totalorder %s1964_s30, %s2126_s0 }
  0x17   :  { %p1970_p10 = pnand %p1968_p9, %p1965_p8 }
  0x19   :  { %1973 = shalt.err (!%p1970_p10)
}
  0x1a   :  { %s1974_s8 = scalar_lea.vmem %s17_s27, 256  ;;  %p1979_p12 = scmp.lt.s32.totalorder %s17_s27, %s17_s27 }
  0x1b   :  { %p1975_p11 = scmp.ne.s32.totalorder %s17_s27, %s1974_s8  ;;  %p1980_p13 = scmp.lt.s32.totalorder %s1974_s8, %s1974_s8 }
  0x1d   :  { %p1981_p0 = por %p1980_p13, %p1979_p12 }
  0x1f   :  { %p1982_p1 = pnand %p1981_p0, %p1975_p11 }
  0x21   :  { %1985 = shalt.err (!%p1982_p1)
}
  0x22   :  { %s2040_s1 = smov 128   ;;  %s2041_s9 = smov 8  }
  0x23   :  { %22 = dma.hbm_to_vmem [thread:$0]  %s2126_s0, 256, %s17_s27, [#allocation4], %s2040_s1, %s2040_s1, %s2041_s9  }
  0x24   :  { %s2042_s12 = smov [#allocation8]   ;;  %s1986_s16 = scalar_lea.hbm %s2128_s2, 8192 }
  0x25   :  { %s40_s13 = sshll.u32 %s2042_s12, 4  ;;  %p1987_p2 = scmp.ne.s32.totalorder %s2128_s2, %s1986_s16  ;;  %s41_s13 = int_to_ptr.vmem [resolvable:$true] %s40_s13 }
  0x26   :  { %p1990_p3 = scmp.lt.u32.totalorder %s1986_s16, %s2128_s2 }
  0x28   :  { %p1992_p4 = pnand %p1990_p3, %p1987_p2 }
  0x2a   :  { %1995 = shalt.err (!%p1992_p4)
}
  0x2b   :  { %s1996_s21 = scalar_lea.vmem %s41_s13, 8192  ;;  %p2001_p6 = scmp.lt.s32.totalorder %s41_s13, %s41_s13 }
  0x2c   :  { %p1997_p5 = scmp.ne.s32.totalorder %s41_s13, %s1996_s21  ;;  %p2002_p7 = scmp.lt.s32.totalorder %s1996_s21, %s1996_s21 }
  0x2e   :  { %p2003_p8 = por %p2002_p7, %p2001_p6 }
  0x30   :  { %p2004_p9 = pnand %p2003_p8, %p1997_p5 }
  0x32   :  { %2007 = shalt.err (!%p2004_p9)
}
  0x33   :  { %46 = dma.hbm_to_vmem [thread:$0]  %s2128_s2, 8192, %s41_s13, [#allocation7], %s2040_s1, %s2040_s1, %s2041_s9  }
  0x34   :  { %2030 = dma.done.wait [#allocation4], 256  }
  0x35   :  { %2031 = vsyncadd [#allocation4], 4294967040 }
  0x36   :  { %2032 = dma.done.wait [#allocation7], 24576  }
  0x37   :  { %2033 = vsyncadd [#allocation7], 4294942720  ;;  %v66_v0 = vld [vmem:[#allocation6] sm:$0xff]  ;;  %v68_v11 = vld [vmem:[#allocation6 + $0x10] sm:$0xff]  ;;  %s2043_s2 = smov [#allocation9]  }
  0x38   :  { %v70_v1 = vld [vmem:[#allocation6 + $0x20] sm:$0xff]  ;;  %v72_v12 = vld [vmem:[#allocation6 + $0x30] sm:$0xff]  ;;  %s1582_s23 = sshll.u32 %s2043_s2, 4  ;;  %s1583_s23 = int_to_ptr.vmem [resolvable:$true] %s1582_s23 }
  0x39   :  { %v74_v2 = vld [vmem:[#allocation6 + $0x40] sm:$0xff]  ;;  %v1598_v3 = vcombine.high %v66_v0, %v70_v1  ;;  %v1597_v4 = vcombine.low %v66_v0, %v70_v1  ;;  %v1602_v15 = vcombine.high %v68_v11, %v72_v12  ;;  %v1601_v16 = vcombine.low %v68_v11, %v72_v12  ;;  %v76_v17 = vld [vmem:[#allocation6 + $0x50] sm:$0xff]  ;;  %s2008_s24 = scalar_lea.vmem %s1583_s23, 512  ;;  %p2013_p11 = scmp.lt.s32.totalorder %s1583_s23, %s1583_s23 }
  0x3a   :  { %v78_v5 = vld [vmem:[#allocation6 + $0x60] sm:$0xff]  ;;  %v80_v18 = vld [vmem:[#allocation6 + $0x70] sm:$0xff]  ;;  %p2009_p10 = scmp.ne.s32.totalorder %s1583_s23, %s2008_s24  ;;  %p2014_p12 = scmp.lt.s32.totalorder %s2008_s24, %s2008_s24 }
  0x3b   :  { %v1606_v6 = vcombine.high %v74_v2, %v78_v5  ;;  %v82_v7 = vld [vmem:[#allocation6 + $0x80] sm:$0xff]  ;;  %844 = vmatprep.subr.bf16.mxu1 %v1598_v3  ;;  %v1605_v9 = vcombine.low %v74_v2, %v78_v5  ;;  %930 = vmatprep.subr.bf16.mxu0 %v1602_v15  ;;  %v1610_v20 = vcombine.high %v76_v17, %v80_v18  ;;  %v84_v21 = vld [vmem:[#allocation6 + $0x90] sm:$0xff] }
  0x3c   :  { %v86_v8 = vld [vmem:[#allocation6 + $0xa0] sm:$0xff]  ;;  %845 = vmatpush1.bf16.msra.mxu1 %v1597_v4  ;;  %v88_v22 = vld [vmem:[#allocation6 + $0xb0] sm:$0xff]  ;;  %931 = vmatpush1.bf16.msra.mxu0 %v1601_v16  ;;  %v1609_v24 = vcombine.low %v76_v17, %v80_v18  ;;  %p2015_p13 = por %p2014_p12, %p2013_p11 }
  0x3d   :  { %846 = vmatprep.subr.bf16.mxu1 %v1606_v6  ;;  %v1614_v10 = vcombine.high %v82_v7, %v86_v8  ;;  %v90_v13 = vld [vmem:[#allocation6 + $0xc0] sm:$0xff]  ;;  %v1613_v19 = vcombine.low %v82_v7, %v86_v8  ;;  %932 = vmatprep.subr.bf16.mxu0 %v1610_v20  ;;  %v1618_v27 = vcombine.high %v84_v21, %v88_v22  ;;  %v92_v28 = vld [vmem:[#allocation6 + $0xd0] sm:$0xff] }
  0x3e   :  { %v94_v14 = vld [vmem:[#allocation6 + $0xe0] sm:$0xff]  ;;  %v96_v29 = vld [vmem:[#allocation6 + $0xf0] sm:$0xff]  ;;  %v1617_v32 = vcombine.low %v84_v21, %v88_v22  ;;  %p2016_p0 = pnand %p2015_p13, %p2009_p10 }
  0x3f   :  { %v1622_v23 = vcombine.high %v90_v13, %v94_v14  ;;  %v98_v25 = vld [vmem:[#allocation6 + $0x100] sm:$0xff]  ;;  %v1621_v30 = vcombine.low %v90_v13, %v94_v14  ;;  %v1626_v35 = vcombine.high %v92_v28, %v96_v29  ;;  %v100_v36 = vld [vmem:[#allocation6 + $0x110] sm:$0xff]  ;;  %v1625_v40 = vcombine.low %v92_v28, %v96_v29 }
  0x40   :  { %847 = vmatpush1.bf16.msra.mxu1 %v1605_v9  ;;  %v102_v26 = vld [vmem:[#allocation6 + $0x120] sm:$0xff]  ;;  %933 = vmatpush1.bf16.msra.mxu0 %v1609_v24  ;;  %v104_v37 = vld [vmem:[#allocation6 + $0x130] sm:$0xff] }
  0x41   :  { %848 = vmatprep.subr.bf16.mxu1 %v1614_v10  ;;  %v1630_v31 = vcombine.high %v98_v25, %v102_v26  ;;  %v106_v33 = vld [vmem:[#allocation6 + $0x140] sm:$0xff]  ;;  %934 = vmatprep.subr.bf16.mxu0 %v1618_v27  ;;  %v1629_v38 = vcombine.low %v98_v25, %v102_v26  ;;  %v2102_v41 = vld [vmem:[#allocation3 + $0x4] ss:$8 sps:$4 sm:$0xff]   ;;  %v1634_v44 = vcombine.high %v100_v36, %v104_v37 }
  0x42   :  { %v110_v34 = vld [vmem:[#allocation6 + $0x160] sm:$0xff]  ;;  %v108_v45 = vld [vmem:[#allocation6 + $0x150] sm:$0xff]  ;;  %876 = vmatprep.mubr.bf16.mxu1 %v2102_v41  ;;  %962 = vmatprep.mubr.bf16.mxu0 %v2102_v41  ;;  %v1633_v49 = vcombine.low %v100_v36, %v104_v37 }
  0x43   :  { %v1638_v39 = vcombine.high %v106_v33, %v110_v34  ;;  %v114_v42 = vld [vmem:[#allocation6 + $0x180] sm:$0xff]  ;;  %v112_v46 = vld [vmem:[#allocation6 + $0x170] sm:$0xff]  ;;  %v1637_v47 = vcombine.low %v106_v33, %v110_v34 }
  0x44   :  { %849 = vmatpush1.bf16.msra.mxu1 %v1613_v19  ;;  %935 = vmatpush1.bf16.msra.mxu0 %v1617_v32  ;;  %v118_v43 = vld [vmem:[#allocation6 + $0x1a0] sm:$0xff]  ;;  %v1642_v52 = vcombine.high %v108_v45, %v112_v46  ;;  %v116_v53 = vld [vmem:[#allocation6 + $0x190] sm:$0xff]  ;;  %v1641_v57 = vcombine.low %v108_v45, %v112_v46 }
  0x45   :  { %850 = vmatprep.subr.bf16.mxu1 %v1622_v23  ;;  %936 = vmatprep.subr.bf16.mxu0 %v1626_v35  ;;  %v1646_v48 = vcombine.high %v114_v42, %v118_v43  ;;  %v122_v50 = vld [vmem:[#allocation6 + $0x1c0] sm:$0xff]  ;;  %v120_v54 = vld [vmem:[#allocation6 + $0x1b0] sm:$0xff]  ;;  %v1645_v55 = vcombine.low %v114_v42, %v118_v43 }
  0x46   :  { %v126_v51 = vld [vmem:[#allocation6 + $0x1e0] sm:$0xff]  ;;  %v1650_v60 = vcombine.high %v116_v53, %v120_v54  ;;  %v124_v61 = vld [vmem:[#allocation6 + $0x1d0] sm:$0xff]  ;;  %v1649_v1 = vcombine.low %v116_v53, %v120_v54 }
  0x47   :  { %v1654_v56 = vcombine.high %v122_v50, %v126_v51  ;;  %v130_v58 = vld [vmem:[#allocation6 + $0x200] sm:$0xff]  ;;  %v128_v62 = vld [vmem:[#allocation6 + $0x1f0] sm:$0xff]  ;;  %v1653_v63 = vcombine.low %v122_v50, %v126_v51 }
  0x48   :  { %851 = vmatpush1.bf16.msra.mxu1 %v1621_v30  ;;  %937 = vmatpush1.bf16.msra.mxu0 %v1625_v40  ;;  %v134_v59 = vld [vmem:[#allocation6 + $0x220] sm:$0xff]  ;;  %v1658_v4 = vcombine.high %v124_v61, %v128_v62  ;;  %v132_v5 = vld [vmem:[#allocation6 + $0x210] sm:$0xff]  ;;  %v1657_v9 = vcombine.low %v124_v61, %v128_v62 }
  0x49   :  { %852 = vmatprep.subr.bf16.mxu1 %v1630_v31  ;;  %938 = vmatprep.subr.bf16.mxu0 %v1634_v44  ;;  %v1662_v0 = vcombine.high %v130_v58, %v134_v59  ;;  %v138_v2 = vld [vmem:[#allocation6 + $0x240] sm:$0xff]  ;;  %v136_v6 = vld [vmem:[#allocation6 + $0x230] sm:$0xff]  ;;  %v1661_v7 = vcombine.low %v130_v58, %v134_v59  ;;  %v71_v58 = vld [vmem:[#allocation6 + $0x28] sm:$0xff] }
  0x4a   :  { %v142_v3 = vld [vmem:[#allocation6 + $0x260] sm:$0xff]  ;;  %v1666_v12 = vcombine.high %v132_v5, %v136_v6  ;;  %v140_v13 = vld [vmem:[#allocation6 + $0x250] sm:$0xff]  ;;  %v1665_v17 = vcombine.low %v132_v5, %v136_v6 }
  0x4b   :  { %v1670_v8 = vcombine.high %v138_v2, %v142_v3  ;;  %v146_v10 = vld [vmem:[#allocation6 + $0x280] sm:$0xff]  ;;  %v144_v14 = vld [vmem:[#allocation6 + $0x270] sm:$0xff]  ;;  %v1669_v15 = vcombine.low %v138_v2, %v142_v3  ;;  %v79_v2 = vld [vmem:[#allocation6 + $0x68] sm:$0xff] }
  0x4c   :  { %853 = vmatpush1.bf16.msra.mxu1 %v1629_v38  ;;  %939 = vmatpush1.bf16.msra.mxu0 %v1633_v49  ;;  %v150_v11 = vld [vmem:[#allocation6 + $0x2a0] sm:$0xff]  ;;  %v1674_v20 = vcombine.high %v140_v13, %v144_v14  ;;  %v148_v21 = vld [vmem:[#allocation6 + $0x290] sm:$0xff]  ;;  %v1673_v27 = vcombine.low %v140_v13, %v144_v14 }
  0x4d   :  { %854 = vmatprep.subr.bf16.mxu1 %v1638_v39  ;;  %940 = vmatprep.subr.bf16.mxu0 %v1642_v52  ;;  %v1678_v16 = vcombine.high %v146_v10, %v150_v11  ;;  %v154_v18 = vld [vmem:[#allocation6 + $0x2c0] sm:$0xff]  ;;  %v152_v22 = vld [vmem:[#allocation6 + $0x2b0] sm:$0xff]  ;;  %v1677_v23 = vcombine.low %v146_v10, %v150_v11  ;;  %v83_v10 = vld [vmem:[#allocation6 + $0x88] sm:$0xff] }
  0x4e   :  { %v158_v19 = vld [vmem:[#allocation6 + $0x2e0] sm:$0xff]  ;;  %v156_v28 = vld [vmem:[#allocation6 + $0x2d0] sm:$0xff]  ;;  %v1682_v30 = vcombine.high %v148_v21, %v152_v22  ;;  %v1681_v35 = vcombine.low %v148_v21, %v152_v22  ;;  %v87_v11 = vld [vmem:[#allocation6 + $0xa8] sm:$0xff] }
  0x4f   :  { %v162_v24 = vld [vmem:[#allocation6 + $0x300] sm:$0xff]  ;;  %v1686_v26 = vcombine.high %v154_v18, %v158_v19  ;;  %v160_v29 = vld [vmem:[#allocation6 + $0x2f0] sm:$0xff]  ;;  %v1685_v31 = vcombine.low %v154_v18, %v158_v19  ;;  %v1616_v14 = vcombine.high %v83_v10, %v87_v11  ;;  %v1615_v19 = vcombine.low %v83_v10, %v87_v11  ;;  %v99_v22 = vld [vmem:[#allocation6 + $0x108] sm:$0xff] }
  0x50   :  { %855 = vmatpush1.bf16.msra.mxu1 %v1637_v47  ;;  %941 = vmatpush1.bf16.msra.mxu0 %v1641_v57  ;;  %v166_v25 = vld [vmem:[#allocation6 + $0x320] sm:$0xff]  ;;  %v164_v36 = vld [vmem:[#allocation6 + $0x310] sm:$0xff]  ;;  %v1690_v38 = vcombine.high %v156_v28, %v160_v29  ;;  %v1689_v44 = vcombine.low %v156_v28, %v160_v29  ;;  %v67_v57 = vld [vmem:[#allocation6 + $0x8] sm:$0xff] }
  0x51   :  { %856 = vmatprep.subr.bf16.mxu1 %v1646_v48  ;;  %942 = vmatprep.subr.bf16.mxu0 %v1650_v60  ;;  %v170_v32 = vld [vmem:[#allocation6 + $0x340] sm:$0xff]  ;;  %v1694_v34 = vcombine.high %v162_v24, %v166_v25  ;;  %v168_v37 = vld [vmem:[#allocation6 + $0x330] sm:$0xff]  ;;  %v1693_v39 = vcombine.low %v162_v24, %v166_v25  ;;  %v107_v28 = vld [vmem:[#allocation6 + $0x148] sm:$0xff] }
  0x52   :  { %v174_v33 = vld [vmem:[#allocation6 + $0x360] sm:$0xff]  ;;  %v172_v45 = vld [vmem:[#allocation6 + $0x350] sm:$0xff]  ;;  %v1698_v47 = vcombine.high %v164_v36, %v168_v37  ;;  %v1697_v52 = vcombine.low %v164_v36, %v168_v37  ;;  %v111_v29 = vld [vmem:[#allocation6 + $0x168] sm:$0xff] }
  0x53   :  { %v178_v40 = vld [vmem:[#allocation6 + $0x380] sm:$0xff]  ;;  %v1702_v43 = vcombine.high %v170_v32, %v174_v33  ;;  %v176_v46 = vld [vmem:[#allocation6 + $0x370] sm:$0xff]  ;;  %v1701_v48 = vcombine.low %v170_v32, %v174_v33  ;;  %v1640_v32 = vcombine.high %v107_v28, %v111_v29  ;;  %v1639_v37 = vcombine.low %v107_v28, %v111_v29  ;;  %v179_v10 = vld [vmem:[#allocation6 + $0x388] sm:$0xff] }
  0x54   :  { %857 = vmatpush1.bf16.msra.mxu1 %v1645_v55  ;;  %943 = vmatpush1.bf16.msra.mxu0 %v1649_v1  ;;  %v182_v42 = vld [vmem:[#allocation6 + $0x3a0] sm:$0xff]  ;;  %v180_v53 = vld [vmem:[#allocation6 + $0x390] sm:$0xff]  ;;  %v1706_v55 = vcombine.high %v172_v45, %v176_v46  ;;  %v1705_v60 = vcombine.low %v172_v45, %v176_v46  ;;  %v75_v1 = vld [vmem:[#allocation6 + $0x48] sm:$0xff] }
  0x55   :  { %858 = vmatprep.subr.bf16.mxu1 %v1654_v56  ;;  %944 = vmatprep.subr.bf16.mxu0 %v1658_v4  ;;  %v186_v49 = vld [vmem:[#allocation6 + $0x3c0] sm:$0xff]  ;;  %v1710_v51 = vcombine.high %v178_v40, %v182_v42  ;;  %v184_v54 = vld [vmem:[#allocation6 + $0x3b0] sm:$0xff]  ;;  %v1709_v56 = vcombine.low %v178_v40, %v182_v42  ;;  %v1600_v4 = vcombine.high %v67_v57, %v71_v58  ;;  %v123_v40 = vld [vmem:[#allocation6 + $0x1c8] sm:$0xff] }
  0x56   :  { %v190_v50 = vld [vmem:[#allocation6 + $0x3e0] sm:$0xff]  ;;  %v188_v61 = vld [vmem:[#allocation6 + $0x3d0] sm:$0xff]  ;;  %v1713_v5 = vcombine.low %v180_v53, %v184_v54  ;;  %v1607_v13 = vcombine.low %v75_v1, %v79_v2  ;;  %v127_v42 = vld [vmem:[#allocation6 + $0x1e8] sm:$0xff] }
  0x57   :  { %v1718_v59 = vcombine.high %v186_v49, %v190_v50  ;;  %v192_v62 = vld [vmem:[#allocation6 + $0x3f0] sm:$0xff]  ;;  %v1822_v24 = vld [vmem:[#allocation8 + $0x24] ss:$8 sps:$4 sm:$0xff]   ;;  %v1656_v45 = vcombine.high %v123_v40, %v127_v42 }
  0x58   :  { %859 = vmatpush1.bf16.msra.mxu1 %v1653_v63  ;;  %945 = vmatpush1.bf16.msra.mxu0 %v1657_v9  ;;  %v1714_v63 = vcombine.high %v180_v53, %v184_v54  ;;  %v2106_v3 = vld [vmem:[#allocation3] ss:$8 sps:$4 sm:$0xff]   ;;  %v1722_v6 = vcombine.high %v188_v61, %v192_v62  ;;  %v1721_v9 = vcombine.low %v188_v61, %v192_v62  ;;  %v1819_v18 = vld [vmem:[#allocation8 + $0x14] ss:$8 sps:$4 sm:$0xff]   ;;  %v1828_v36 = vld [vmem:[#allocation8 + $0x44] ss:$8 sps:$4 sm:$0xff]  }
  0x59   :  { %860 = vmatprep.subr.bf16.mxu1 %v1662_v0  ;;  %946 = vmatprep.subr.bf16.mxu0 %v1666_v12  ;;  %v1717_v0 = vcombine.low %v186_v49, %v190_v50  ;;  %v1816_v12 = vld [vmem:[#allocation8 + $0x4] ss:$8 sps:$4 sm:$0xff]   ;;  %v1817_v21 = vld [vmem:[#allocation8 + $0x10] ss:$8 sps:$4 sm:$0xff]   ;;  %v1655_v50 = vcombine.low %v123_v40, %v127_v42 }
  0x5a   :  { %v1823_v33 = vld [vmem:[#allocation8 + $0x30] ss:$8 sps:$4 sm:$0xff]   ;;  %v1834_v49 = vld [vmem:[#allocation8 + $0x64] ss:$8 sps:$4 sm:$0xff]  }
  0x5b   :  { %v1829_v46 = vld [vmem:[#allocation8 + $0x50] ss:$8 sps:$4 sm:$0xff]   ;;  %v139_v53 = vld [vmem:[#allocation6 + $0x248] sm:$0xff] }
  0x5c   :  { %861 = vmatpush1.bf16.msra.mxu1 %v1661_v7  ;;  %947 = vmatpush1.bf16.msra.mxu0 %v1665_v17  ;;  %v1599_v7 = vcombine.low %v67_v57, %v71_v58  ;;  %v95_v17 = vld [vmem:[#allocation6 + $0xe8] sm:$0xff]  ;;  %v117_v42 = vld [vmem:[#allocation6 + $0x198] sm:$0xff] }
  0x5d   :  { %862 = vmatprep.subr.bf16.mxu1 %v1670_v8  ;;  %948 = vmatprep.subr.bf16.mxu0 %v1674_v20  ;;  %v1608_v8 = vcombine.high %v75_v1, %v79_v2  ;;  %v143_v54 = vld [vmem:[#allocation6 + $0x268] sm:$0xff] }
  0x5e   :  { %v147_v57 = vld [vmem:[#allocation6 + $0x288] sm:$0xff] }
  0x5f   :  { %v151_v58 = vld [vmem:[#allocation6 + $0x2a8] sm:$0xff] }
  0x60   :  { %863 = vmatpush1.bf16.msra.mxu1 %v1669_v15  ;;  %949 = vmatpush1.bf16.msra.mxu0 %v1673_v27  ;;  %v1814_v15 = vld [vmem:[#allocation8] ss:$8 sps:$4 sm:$0xff]  }
  0x61   :  { %864 = vmatprep.subr.bf16.mxu1 %v1678_v16  ;;  %950 = vmatprep.subr.bf16.mxu0 %v1682_v30  ;;  %v91_v16 = vld [vmem:[#allocation6 + $0xc8] sm:$0xff]  ;;  %v1825_v30 = vld [vmem:[#allocation8 + $0x34] ss:$8 sps:$4 sm:$0xff]  }
  0x62   :  { %v1624_v20 = vcombine.high %v91_v16, %v95_v17  ;;  %v1623_v25 = vcombine.low %v91_v16, %v95_v17  ;;  %v1820_v27 = vld [vmem:[#allocation8 + $0x20] ss:$8 sps:$4 sm:$0xff]  }
  0x63   :  { %v155_v61 = vld [vmem:[#allocation6 + $0x2c8] sm:$0xff] }
  0x64   :  { %865 = vmatpush1.bf16.msra.mxu1 %v1677_v23  ;;  %951 = vmatpush1.bf16.msra.mxu0 %v1681_v35  ;;  %v103_v23 = vld [vmem:[#allocation6 + $0x128] sm:$0xff] }
  0x65   :  { %866 = vmatprep.subr.bf16.mxu1 %v1686_v26  ;;  %952 = vmatprep.subr.bf16.mxu0 %v1690_v38  ;;  %v1632_v26 = vcombine.high %v99_v22, %v103_v23  ;;  %v119_v35 = vld [vmem:[#allocation6 + $0x1a8] sm:$0xff] }
  0x66   :  { %v159_v62 = vld [vmem:[#allocation6 + $0x2e8] sm:$0xff] }
  0x67   :  { %v163_v1 = vld [vmem:[#allocation6 + $0x308] sm:$0xff] }
  0x68   :  { %867 = vmatpush1.bf16.msra.mxu1 %v1685_v31  ;;  %953 = vmatpush1.bf16.msra.mxu0 %v1689_v44  ;;  %v1631_v31 = vcombine.low %v99_v22, %v103_v23  ;;  %v167_v2 = vld [vmem:[#allocation6 + $0x328] sm:$0xff]  ;;  %v77_v22 = vld [vmem:[#allocation6 + $0x58] sm:$0xff] }
  0x69   :  { %868 = vmatprep.subr.bf16.mxu1 %v1694_v34  ;;  %954 = vmatprep.subr.bf16.mxu0 %v1698_v47  ;;  %v115_v34 = vld [vmem:[#allocation6 + $0x188] sm:$0xff]  ;;  %v81_v23 = vld [vmem:[#allocation6 + $0x78] sm:$0xff] }
  0x6a   :  { %v1648_v38 = vcombine.high %v115_v34, %v119_v35  ;;  %v1647_v44 = vcombine.low %v115_v34, %v119_v35  ;;  %v131_v47 = vld [vmem:[#allocation6 + $0x208] sm:$0xff]  ;;  %v1611_v28 = vcombine.low %v77_v22, %v81_v23  ;;  %v101_v34 = vld [vmem:[#allocation6 + $0x118] sm:$0xff] }
  0x6b   :  { %v183_v11 = vld [vmem:[#allocation6 + $0x3a8] sm:$0xff]  ;;  %v105_v35 = vld [vmem:[#allocation6 + $0x138] sm:$0xff] }
  0x6c   :  { %869 = vmatpush1.bf16.msra.mxu1 %v1693_v39  ;;  %955 = vmatpush1.bf16.msra.mxu0 %v1697_v52  ;;  %v1826_v39 = vld [vmem:[#allocation8 + $0x40] ss:$8 sps:$4 sm:$0xff]   ;;  %v1711_v16 = vcombine.low %v179_v10, %v183_v11  ;;  %v1635_v40 = vcombine.low %v101_v34, %v105_v35 }
  0x6d   :  { %870 = vmatprep.subr.bf16.mxu1 %v1702_v43  ;;  %956 = vmatprep.subr.bf16.mxu0 %v1706_v55  ;;  %v1831_v43 = vld [vmem:[#allocation8 + $0x54] ss:$8 sps:$4 sm:$0xff]   ;;  %v1832_v52 = vld [vmem:[#allocation8 + $0x60] ss:$8 sps:$4 sm:$0xff]  }
  0x70   :  { %871 = vmatpush1.bf16.msra.mxu1 %v1701_v48  ;;  %957 = vmatpush1.bf16.msra.mxu0 %v1705_v60  ;;  %v135_v48 = vld [vmem:[#allocation6 + $0x228] sm:$0xff]  ;;  %v1680_v60 = vcombine.high %v147_v57, %v151_v58 }
  0x71   :  { %872 = vmatprep.subr.bf16.mxu1 %v1710_v51  ;;  %958 = vmatprep.subr.bf16.mxu0 %v1714_v63  ;;  %v1664_v51 = vcombine.high %v131_v47, %v135_v48  ;;  %v1663_v55 = vcombine.low %v131_v47, %v135_v48  ;;  %v1679_v63 = vcombine.low %v147_v57, %v151_v58  ;;  %v125_v47 = vld [vmem:[#allocation6 + $0x1d8] sm:$0xff] }
  0x72   :  { %v129_v48 = vld [vmem:[#allocation6 + $0x1f8] sm:$0xff] }
  0x73   :  { %v1843_v58 = vld [vmem:[#allocation8 + $0x94] ss:$8 sps:$4 sm:$0xff]  }
  0x74   :  { %873 = vmatpush1.bf16.msra.mxu1 %v1709_v56  ;;  %959 = vmatpush1.bf16.msra.mxu0 %v1713_v5  ;;  %v1672_v56 = vcombine.high %v139_v53, %v143_v54  ;;  %v1696_v5 = vcombine.high %v163_v1, %v167_v2 }
  0x75   :  { %874 = vmatprep.subr.bf16.mxu1 %v1718_v59  ;;  %960 = vmatprep.subr.bf16.mxu0 %v1722_v6  ;;  %v1671_v59 = vcombine.low %v139_v53, %v143_v54  ;;  %v171_v6 = vld [vmem:[#allocation6 + $0x348] sm:$0xff]  ;;  %v133_v53 = vld [vmem:[#allocation6 + $0x218] sm:$0xff] }
  0x76   :  { %v137_v54 = vld [vmem:[#allocation6 + $0x238] sm:$0xff] }
  0x77   :  { %v1668_v57 = vcombine.high %v133_v53, %v137_v54 }
  0x78   :  { %875 = vmatpush1.bf16.msra.mxu1 %v1717_v0  ;;  %961 = vmatpush1.bf16.msra.mxu0 %v1721_v9  ;;  %v1688_v0 = vcombine.high %v155_v61, %v159_v62 }
  0x79   :  { %887 = vmatprep.subr.bf16.mxu1 %v1600_v4  ;;  %1472 = vmatprep.subr.bf16.mxu0 %v1816_v12  ;;  %v1687_v4 = vcombine.low %v155_v61, %v159_v62  ;;  %v1841_v61 = vld [vmem:[#allocation8 + $0x90] ss:$8 sps:$4 sm:$0xff]   ;;  %v1667_v62 = vcombine.low %v133_v53, %v137_v54 }
  0x7b   :  { %877 = vmatmul.mubr.bf16.vlgmr.msra.gmra.mrb[0].mxu1 %v2106_v3  ;;  %963 = vmatmul.mubr.bf16.vlgmr.msra.gmra.mrb[0].mxu0 %v2106_v3 }
  0x7c   :  { %888 = vmatpush1.bf16.msra.mxu1 %v1599_v7  ;;  %919 = vmatprep.mubr.bf16.mxu1 %v2102_v41  ;;  %v175_v7 = vld [vmem:[#allocation6 + $0x368] sm:$0xff] }
  0x7d   :  { %889 = vmatprep.subr.bf16.mxu1 %v1608_v8  ;;  %1473 = vmatpush1.bf16.msra.mxu0 %v1814_v15  ;;  %v1695_v8 = vcombine.low %v163_v1, %v167_v2  ;;  %v1704_v9 = vcombine.high %v171_v6, %v175_v7  ;;  %v1703_v12 = vcombine.low %v171_v6, %v175_v7  ;;  %v191_v15 = vld [vmem:[#allocation6 + $0x3e8] sm:$0xff]  ;;  %v149_v1 = vld [vmem:[#allocation6 + $0x298] sm:$0xff] }
  0x7e   :  { %1474 = vmatprep.subr.bf16.mxu0 %v1819_v18  ;;  %v69_v18 = vld [vmem:[#allocation6 + $0x18] sm:$0xff] }
  0x7f   :  { %v153_v2 = vld [vmem:[#allocation6 + $0x2b8] sm:$0xff] }
  0x80   :  { %890 = vmatpush1.bf16.msra.mxu1 %v1607_v13  ;;  %v1712_v13 = vcombine.high %v179_v10, %v183_v11  ;;  %v1684_v6 = vcombine.high %v149_v1, %v153_v2  ;;  %v1849_v7 = vld [vmem:[#allocation8 + $0xb4] ss:$8 sps:$4 sm:$0xff]   ;;  %v1847_v10 = vld [vmem:[#allocation8 + $0xb0] ss:$8 sps:$4 sm:$0xff]   ;;  %v1683_v11 = vcombine.low %v149_v1, %v153_v2 }
  0x81   :  { %891 = vmatprep.subr.bf16.mxu1 %v1616_v14  ;;  %1475 = vmatpush1.bf16.msra.mxu0 %v1817_v21  ;;  %v187_v14 = vld [vmem:[#allocation6 + $0x3c8] sm:$0xff] }
  0x82   :  { %1476 = vmatprep.subr.bf16.mxu0 %v1822_v24  ;;  %v1720_v17 = vcombine.high %v187_v14, %v191_v15 }
  0x84   :  { %892 = vmatpush1.bf16.msra.mxu1 %v1615_v19  ;;  %v73_v19 = vld [vmem:[#allocation6 + $0x38] sm:$0xff] }
  0x85   :  { %893 = vmatprep.subr.bf16.mxu1 %v1624_v20  ;;  %1477 = vmatpush1.bf16.msra.mxu0 %v1820_v27  ;;  %v1719_v20 = vcombine.low %v187_v14, %v191_v15  ;;  %v1604_v21 = vcombine.high %v69_v18, %v73_v19  ;;  %v1603_v24 = vcombine.low %v69_v18, %v73_v19  ;;  %v89_v27 = vld [vmem:[#allocation6 + $0xb8] sm:$0xff] }
  0x86   :  { %1478 = vmatprep.subr.bf16.mxu0 %v1825_v30  ;;  %v93_v30 = vld [vmem:[#allocation6 + $0xd8] sm:$0xff] }
  0x87   :  { %v165_v14 = vld [vmem:[#allocation6 + $0x318] sm:$0xff] }
  0x88   :  { %894 = vmatpush1.bf16.msra.mxu1 %v1623_v25  ;;  %v1612_v25 = vcombine.high %v77_v22, %v81_v23  ;;  %v169_v15 = vld [vmem:[#allocation6 + $0x338] sm:$0xff] }
  0x89   :  { %895 = vmatprep.subr.bf16.mxu1 %v1632_v26  ;;  %1479 = vmatpush1.bf16.msra.mxu0 %v1823_v33  ;;  %v85_v26 = vld [vmem:[#allocation6 + $0x98] sm:$0xff]  ;;  %v1700_v18 = vcombine.high %v165_v14, %v169_v15  ;;  %v1699_v23 = vcombine.low %v165_v14, %v169_v15 }
  0x8a   :  { %1480 = vmatprep.subr.bf16.mxu0 %v1828_v36  ;;  %v1620_v29 = vcombine.high %v85_v26, %v89_v27  ;;  %v1855_v19 = vld [vmem:[#allocation8 + $0xd4] ss:$8 sps:$4 sm:$0xff]   ;;  %v1853_v22 = vld [vmem:[#allocation8 + $0xd0] ss:$8 sps:$4 sm:$0xff]  }
  0x8b   :  { %v1873_v14 = vld [vmem:[#allocation8 + $0x134] ss:$8 sps:$4 sm:$0xff]   ;;  %v1871_v15 = vld [vmem:[#allocation8 + $0x130] ss:$8 sps:$4 sm:$0xff]  }
  0x8c   :  { %896 = vmatpush1.bf16.msra.mxu1 %v1631_v31  ;;  %v97_v31 = vld [vmem:[#allocation6 + $0xf8] sm:$0xff] }
  0x8d   :  { %897 = vmatprep.subr.bf16.mxu1 %v1640_v32  ;;  %1481 = vmatpush1.bf16.msra.mxu0 %v1826_v39  ;;  %v1619_v32 = vcombine.low %v85_v26, %v89_v27  ;;  %v1628_v33 = vcombine.high %v93_v30, %v97_v31  ;;  %v1627_v36 = vcombine.low %v93_v30, %v97_v31  ;;  %v113_v39 = vld [vmem:[#allocation6 + $0x178] sm:$0xff] }
  0x8e   :  { %1482 = vmatprep.subr.bf16.mxu0 %v1831_v43  ;;  %v121_v43 = vld [vmem:[#allocation6 + $0x1b8] sm:$0xff] }
  0x8f   :  { %v181_v26 = vld [vmem:[#allocation6 + $0x398] sm:$0xff] }
  0x90   :  { %898 = vmatpush1.bf16.msra.mxu1 %v1639_v37  ;;  %v1636_v37 = vcombine.high %v101_v34, %v105_v35  ;;  %v185_v27 = vld [vmem:[#allocation6 + $0x3b8] sm:$0xff] }
  0x91   :  { %899 = vmatprep.subr.bf16.mxu1 %v1648_v38  ;;  %1483 = vmatpush1.bf16.msra.mxu0 %v1829_v46  ;;  %v109_v38 = vld [vmem:[#allocation6 + $0x158] sm:$0xff]  ;;  %v1716_v30 = vcombine.high %v181_v26, %v185_v27  ;;  %v1715_v35 = vcombine.low %v181_v26, %v185_v27 }
  0x92   :  { %1484 = vmatprep.subr.bf16.mxu0 %v1834_v49  ;;  %v1837_v46 = vld [vmem:[#allocation8 + $0x74] ss:$8 sps:$4 sm:$0xff]   ;;  %v1835_v49 = vld [vmem:[#allocation8 + $0x70] ss:$8 sps:$4 sm:$0xff]  }
  0x93   :  { %v1861_v31 = vld [vmem:[#allocation8 + $0xf4] ss:$8 sps:$4 sm:$0xff]   ;;  %v1859_v34 = vld [vmem:[#allocation8 + $0xf0] ss:$8 sps:$4 sm:$0xff]  }
  0x94   :  { %900 = vmatpush1.bf16.msra.mxu1 %v1647_v44  ;;  %v1643_v44 = vcombine.low %v109_v38, %v113_v39 }
  0x95   :  { %901 = vmatprep.subr.bf16.mxu1 %v1656_v45  ;;  %1485 = vmatpush1.bf16.msra.mxu0 %v1832_v52  ;;  %v1652_v45 = vcombine.high %v117_v42, %v121_v43  ;;  %v1840_v52 = vld [vmem:[#allocation8 + $0x84] ss:$8 sps:$4 sm:$0xff]  }
  0x96   :  { %1486 = vmatprep.subr.bf16.mxu0 %v1837_v46 }
  0x98   :  { %902 = vmatpush1.bf16.msra.mxu1 %v1655_v50  ;;  %v1651_v50 = vcombine.low %v117_v42, %v121_v43 }
  0x99   :  { %903 = vmatprep.subr.bf16.mxu1 %v1664_v51  ;;  %1487 = vmatpush1.bf16.msra.mxu0 %v1835_v49  ;;  %v1660_v51 = vcombine.high %v125_v47, %v129_v48 }
  0x9a   :  { %1488 = vmatprep.subr.bf16.mxu0 %v1840_v52 }
  0x9c   :  { %904 = vmatpush1.bf16.msra.mxu1 %v1663_v55  ;;  %v1838_v55 = vld [vmem:[#allocation8 + $0x80] ss:$8 sps:$4 sm:$0xff]  }
  0x9d   :  { %905 = vmatprep.subr.bf16.mxu1 %v1672_v56  ;;  %v1659_v56 = vcombine.low %v125_v47, %v129_v48  ;;  %1489 = vmatpush1.bf16.msra.mxu0 %v1838_v55 }
  0x9e   :  { %1490 = vmatprep.subr.bf16.mxu0 %v1843_v58 }
  0xa0   :  { %906 = vmatpush1.bf16.msra.mxu1 %v1671_v59  ;;  %v141_v59 = vld [vmem:[#allocation6 + $0x258] sm:$0xff] }
  0xa1   :  { %907 = vmatprep.subr.bf16.mxu1 %v1680_v60  ;;  %v145_v60 = vld [vmem:[#allocation6 + $0x278] sm:$0xff]  ;;  %1491 = vmatpush1.bf16.msra.mxu0 %v1841_v61 }
  0xa4   :  { %908 = vmatpush1.bf16.msra.mxu1 %v1679_v63  ;;  %v1676_v63 = vcombine.high %v141_v59, %v145_v60 }
  0xa5   :  { %909 = vmatprep.subr.bf16.mxu1 %v1688_v0  ;;  %v1846_v0 = vld [vmem:[#allocation8 + $0xa4] ss:$8 sps:$4 sm:$0xff]  }
  0xa6   :  { %1492 = vmatprep.subr.bf16.mxu0 %v1846_v0 }
  0xa8   :  { %910 = vmatpush1.bf16.msra.mxu1 %v1687_v4  ;;  %v1844_v4 = vld [vmem:[#allocation8 + $0xa0] ss:$8 sps:$4 sm:$0xff]  }
  0xa9   :  { %911 = vmatprep.subr.bf16.mxu1 %v1696_v5  ;;  %v1675_v5 = vcombine.low %v141_v59, %v145_v60  ;;  %1493 = vmatpush1.bf16.msra.mxu0 %v1844_v4 }
  0xaa   :  { %1494 = vmatprep.subr.bf16.mxu0 %v1849_v7 }
  0xac   :  { %912 = vmatpush1.bf16.msra.mxu1 %v1695_v8  ;;  %v157_v8 = vld [vmem:[#allocation6 + $0x2d8] sm:$0xff] }
  0xad   :  { %913 = vmatprep.subr.bf16.mxu1 %v1704_v9  ;;  %v161_v9 = vld [vmem:[#allocation6 + $0x2f8] sm:$0xff]  ;;  %1495 = vmatpush1.bf16.msra.mxu0 %v1847_v10 }
  0xae   :  { %v1867_v10 = vld [vmem:[#allocation8 + $0x114] ss:$8 sps:$4 sm:$0xff]  }
  0xb0   :  { %914 = vmatpush1.bf16.msra.mxu1 %v1703_v12  ;;  %v1692_v12 = vcombine.high %v157_v8, %v161_v9 }
  0xb1   :  { %915 = vmatprep.subr.bf16.mxu1 %v1712_v13  ;;  %v1852_v13 = vld [vmem:[#allocation8 + $0xc4] ss:$8 sps:$4 sm:$0xff]  }
  0xb2   :  { %1496 = vmatprep.subr.bf16.mxu0 %v1852_v13  ;;  %v1868_v13 = vld [vmem:[#allocation8 + $0x120] ss:$8 sps:$4 sm:$0xff]  }
  0xb4   :  { %916 = vmatpush1.bf16.msra.mxu1 %v1711_v16  ;;  %v1850_v16 = vld [vmem:[#allocation8 + $0xc0] ss:$8 sps:$4 sm:$0xff]  }
  0xb5   :  { %917 = vmatprep.subr.bf16.mxu1 %v1720_v17  ;;  %v1691_v17 = vcombine.low %v157_v8, %v161_v9  ;;  %1497 = vmatpush1.bf16.msra.mxu0 %v1850_v16  ;;  %v1862_v9 = vld [vmem:[#allocation8 + $0x100] ss:$8 sps:$4 sm:$0xff]   ;;  %v1876_v16 = vld [vmem:[#allocation8 + $0x144] ss:$8 sps:$4 sm:$0xff]  }
  0xb6   :  { %1498 = vmatprep.subr.bf16.mxu0 %v1855_v19  ;;  %v1877_v19 = vld [vmem:[#allocation8 + $0x150] ss:$8 sps:$4 sm:$0xff]  }
  0xb8   :  { %918 = vmatpush1.bf16.msra.mxu1 %v1719_v20  ;;  %v173_v20 = vld [vmem:[#allocation6 + $0x358] sm:$0xff] }
  0xb9   :  { %973 = vmatprep.subr.bf16.mxu1 %v1604_v21  ;;  %v177_v21 = vld [vmem:[#allocation6 + $0x378] sm:$0xff]  ;;  %1499 = vmatpush1.bf16.msra.mxu0 %v1853_v22 }
  0xba   :  { %v1885_v22 = vld [vmem:[#allocation8 + $0x174] ss:$8 sps:$4 sm:$0xff]  }
  0xbb   :  { %920 = vmatmul.mubr.bf16.vlgmr.msra.gmra.mrb[4].mxu1 %v2106_v3 }
  0xbc   :  { %974 = vmatpush1.bf16.msra.mxu1 %v1603_v24  ;;  %1005 = vmatprep.mubr.bf16.mxu1 %v2102_v41  ;;  %v1644_v41 = vcombine.high %v109_v38, %v113_v39  ;;  %v1708_v24 = vcombine.high %v173_v20, %v177_v21  ;;  %v1864_v38 = vld [vmem:[#allocation8 + $0x104] ss:$8 sps:$4 sm:$0xff]  }
  0xbd   :  { %975 = vmatprep.subr.bf16.mxu1 %v1612_v25  ;;  %v1858_v25 = vld [vmem:[#allocation8 + $0xe4] ss:$8 sps:$4 sm:$0xff]  }
  0xbe   :  { %1500 = vmatprep.subr.bf16.mxu0 %v1858_v25 }
  0xc0   :  { %976 = vmatpush1.bf16.msra.mxu1 %v1611_v28  ;;  %v1856_v28 = vld [vmem:[#allocation8 + $0xe0] ss:$8 sps:$4 sm:$0xff]  }
  0xc1   :  { %977 = vmatprep.subr.bf16.mxu1 %v1620_v29  ;;  %v1707_v29 = vcombine.low %v173_v20, %v177_v21  ;;  %1501 = vmatpush1.bf16.msra.mxu0 %v1856_v28  ;;  %v1882_v20 = vld [vmem:[#allocation8 + $0x164] ss:$8 sps:$4 sm:$0xff]   ;;  %v1880_v21 = vld [vmem:[#allocation8 + $0x160] ss:$8 sps:$4 sm:$0xff]  }
  0xc2   :  { %1502 = vmatprep.subr.bf16.mxu0 %v1861_v31  ;;  %v1886_v28 = vld [vmem:[#allocation8 + $0x180] ss:$8 sps:$4 sm:$0xff]   ;;  %v1889_v31 = vld [vmem:[#allocation8 + $0x190] ss:$8 sps:$4 sm:$0xff]  }
  0xc4   :  { %978 = vmatpush1.bf16.msra.mxu1 %v1619_v32  ;;  %v189_v32 = vld [vmem:[#allocation6 + $0x3d8] sm:$0xff] }
  0xc5   :  { %979 = vmatprep.subr.bf16.mxu1 %v1628_v33  ;;  %v193_v33 = vld [vmem:[#allocation6 + $0x3f8] sm:$0xff]  ;;  %1503 = vmatpush1.bf16.msra.mxu0 %v1859_v34 }
  0xc6   :  { %1515 = vmatprep.subr.bf16.mxu0 %v1864_v38  ;;  %v1897_v34 = vld [vmem:[#allocation8 + $0x1b4] ss:$8 sps:$4 sm:$0xff]  }
  0xc7   :  { %v1903_v38 = vld [vmem:[#allocation8 + $0x1d4] ss:$8 sps:$4 sm:$0xff]  }
  0xc8   :  { %980 = vmatpush1.bf16.msra.mxu1 %v1627_v36  ;;  %v1724_v36 = vcombine.high %v189_v32, %v193_v33 }
  0xc9   :  { %981 = vmatprep.subr.bf16.mxu1 %v1636_v37  ;;  %v1723_v37 = vcombine.low %v189_v32, %v193_v33  ;;  %v1894_v32 = vld [vmem:[#allocation8 + $0x1a4] ss:$8 sps:$4 sm:$0xff]   ;;  %v1892_v33 = vld [vmem:[#allocation8 + $0x1a0] ss:$8 sps:$4 sm:$0xff]  }
  0xcc   :  { %982 = vmatpush1.bf16.msra.mxu1 %v1635_v40 }
  0xcd   :  { %983 = vmatprep.subr.bf16.mxu1 %v1644_v41 }
  0xd0   :  { %984 = vmatpush1.bf16.msra.mxu1 %v1643_v44 }
  0xd1   :  { %985 = vmatprep.subr.bf16.mxu1 %v1652_v45 }
  0xd4   :  { %986 = vmatpush1.bf16.msra.mxu1 %v1651_v50 }
  0xd5   :  { %987 = vmatprep.subr.bf16.mxu1 %v1660_v51 }
  0xd8   :  { %988 = vmatpush1.bf16.msra.mxu1 %v1659_v56 }
  0xd9   :  { %989 = vmatprep.subr.bf16.mxu1 %v1668_v57 }
  0xdc   :  { %990 = vmatpush1.bf16.msra.mxu1 %v1667_v62 }
  0xdd   :  { %991 = vmatprep.subr.bf16.mxu1 %v1676_v63 }
  0xe0   :  { %992 = vmatpush1.bf16.msra.mxu1 %v1675_v5 }
  0xe1   :  { %993 = vmatprep.subr.bf16.mxu1 %v1684_v6 }
  0xe4   :  { %994 = vmatpush1.bf16.msra.mxu1 %v1683_v11  ;;  %v1865_v11 = vld [vmem:[#allocation8 + $0x110] ss:$8 sps:$4 sm:$0xff]  }
  0xe5   :  { %995 = vmatprep.subr.bf16.mxu1 %v1692_v12  ;;  %v1870_v12 = vld [vmem:[#allocation8 + $0x124] ss:$8 sps:$4 sm:$0xff]  }
  0xe8   :  { %996 = vmatpush1.bf16.msra.mxu1 %v1691_v17  ;;  %v1874_v17 = vld [vmem:[#allocation8 + $0x140] ss:$8 sps:$4 sm:$0xff]  }
  0xe9   :  { %997 = vmatprep.subr.bf16.mxu1 %v1700_v18  ;;  %v1879_v18 = vld [vmem:[#allocation8 + $0x154] ss:$8 sps:$4 sm:$0xff]  }
  0xec   :  { %998 = vmatpush1.bf16.msra.mxu1 %v1699_v23  ;;  %v1883_v23 = vld [vmem:[#allocation8 + $0x170] ss:$8 sps:$4 sm:$0xff]  }
  0xed   :  { %999 = vmatprep.subr.bf16.mxu1 %v1708_v24  ;;  %v1888_v24 = vld [vmem:[#allocation8 + $0x184] ss:$8 sps:$4 sm:$0xff]  }
  0xf0   :  { %1000 = vmatpush1.bf16.msra.mxu1 %v1707_v29 }
  0xf1   :  { %1001 = vmatprep.subr.bf16.mxu1 %v1716_v30  ;;  %v1891_v30 = vld [vmem:[#allocation8 + $0x194] ss:$8 sps:$4 sm:$0xff]  }
  0xf4   :  { %1002 = vmatpush1.bf16.msra.mxu1 %v1715_v35  ;;  %v1895_v35 = vld [vmem:[#allocation8 + $0x1b0] ss:$8 sps:$4 sm:$0xff]  }
  0xf5   :  { %1003 = vmatprep.subr.bf16.mxu1 %v1724_v36  ;;  %v1900_v36 = vld [vmem:[#allocation8 + $0x1c4] ss:$8 sps:$4 sm:$0xff]  }
  0xf8   :  { %1004 = vmatpush1.bf16.msra.mxu1 %v1723_v37  ;;  %v1898_v37 = vld [vmem:[#allocation8 + $0x1c0] ss:$8 sps:$4 sm:$0xff]  }
  0xfb   :  { %1006 = vmatmul.mubr.bf16.vlgmr.msra.gmra.mrb[8].mxu1 %v2106_v3 }
 0x14e   :  { %v878_v39 = vpop.f32.mrb[0].mxu1  ;;  %v964_v47 = vpop.f32.mrb[0].mxu0 }
 0x14f   :  { %v1725_v40 = vmul.f32 -1.442695, %v878_v39  ;;  %v880_v41 = vpop.f32.mrb[1].mxu1  ;;  %v966_v48 = vpop.f32.mrb[1].mxu0 }
 0x150   :  { %v1726_v42 = vmul.f32 -1.442695, %v880_v41  ;;  %v882_v43 = vpop.f32.mrb[2].mxu1  ;;  %v968_v49 = vpop.f32.mrb[2].mxu0 }
 0x151   :  { %1910 = vpow2.f32 %v1725_v40  ;;  %v1729_v44 = vmul.f32 -1.442695, %v882_v43  ;;  %v884_v45 = vpop.f32.mrb[3].mxu1  ;;  %v970_v50 = vpop.f32.mrb[3].mxu0  ;;  %v1906_v40 = vld [vmem:[#allocation8 + $0x1e4] ss:$8 sps:$4 sm:$0xff]  }
 0x152   :  { %1912 = vpow2.f32 %v1726_v42  ;;  %v1730_v46 = vmul.f32 -1.442695, %v884_v45  ;;  %v1909_v42 = vld [vmem:[#allocation8 + $0x1f4] ss:$8 sps:$4 sm:$0xff]  }
 0x153   :  { %1914 = vpow2.f32 %v1729_v44 }
 0x154   :  { %1916 = vpow2.f32 %v1730_v46 }
 0x15b   :  { %v1911_v51 = vpop.eup %1910 }
 0x15c   :  { %v1913_v3 = vpop.eup %1912  ;;  %v1040_v52 = vadd.f32 1.0, %v1911_v51 }
 0x15d   :  { %v1915_v53 = vpop.eup %1914  ;;  %v1041_v54 = vadd.f32 1.0, %v1913_v3 }
 0x15e   :  { %v1917_v55 = vpop.eup %1916  ;;  %1918 = vrcp.f32 %v1040_v52  ;;  %v1044_v56 = vadd.f32 1.0, %v1915_v53 }
 0x15f   :  { %1920 = vrcp.f32 %v1041_v54  ;;  %v1045_v57 = vadd.f32 1.0, %v1917_v55 }
 0x160   :  { %1922 = vrcp.f32 %v1044_v56 }
 0x161   :  { %1924 = vrcp.f32 %v1045_v57 }
 0x168   :  { %v1919_v58 = vpop.eup %1918 }
 0x169   :  { %v1921_v59 = vpop.eup %1920  ;;  %v1064_v60 = vmul.f32 %v1919_v58, %v878_v39  ;;  %v1901_v39 = vld [vmem:[#allocation8 + $0x1d0] ss:$8 sps:$4 sm:$0xff]  }
 0x16a   :  { %v1923_v61 = vpop.eup %1922  ;;  %v1065_v62 = vmul.f32 %v1921_v59, %v880_v41  ;;  %v1904_v41 = vld [vmem:[#allocation8 + $0x1e0] ss:$8 sps:$4 sm:$0xff]  }
 0x16b   :  { %v1925_v63 = vpop.eup %1924  ;;  %v1068_v0 = vmul.f32 %v1923_v61, %v882_v43  ;;  %v1072_v1 = vmul.f32 %v1064_v60, %v964_v47 }
 0x16c   :  { %v1069_v2 = vmul.f32 %v1925_v63, %v884_v45  ;;  %v1073_v4 = vmul.f32 %v1065_v62, %v966_v48  ;;  %v1907_v45 = vld [vmem:[#allocation8 + $0x1f0] ss:$8 sps:$4 sm:$0xff]  }
 0x16d   :  { %v1076_v5 = vmul.f32 %v1068_v0, %v968_v49 }
 0x16e   :  { %v1077_v6 = vmul.f32 %v1069_v2, %v970_v50 }
 0x16f   :  { %v1084_v7 = vpack.c.bf16 %v1076_v5, %v1072_v1 }
 0x170   :  { %v1085_v8 = vpack.c.bf16 %v1077_v6, %v1073_v4 }
 0x172   :  { %1504 = vmatprep.mubr.bf16.mxu0 %v1085_v8 }
 0x173   :  { %1505 = vmatmul.mubr.bf16.vlgmr.msra.gmra.mrb[4].mxu0 %v1084_v7 }
 0x174   :  { %1516 = vmatpush1.bf16.msra.mxu0 %v1862_v9 }
 0x175   :  { %1517 = vmatprep.subr.bf16.mxu0 %v1867_v10 }
 0x178   :  { %1518 = vmatpush1.bf16.msra.mxu0 %v1865_v11 }
 0x179   :  { %1519 = vmatprep.subr.bf16.mxu0 %v1870_v12 }
 0x17c   :  { %1520 = vmatpush1.bf16.msra.mxu0 %v1868_v13 }
 0x17d   :  { %1521 = vmatprep.subr.bf16.mxu0 %v1873_v14 }
 0x180   :  { %1522 = vmatpush1.bf16.msra.mxu0 %v1871_v15 }
 0x181   :  { %1523 = vmatprep.subr.bf16.mxu0 %v1876_v16 }
 0x184   :  { %1524 = vmatpush1.bf16.msra.mxu0 %v1874_v17 }
 0x185   :  { %1525 = vmatprep.subr.bf16.mxu0 %v1879_v18 }
 0x188   :  { %1526 = vmatpush1.bf16.msra.mxu0 %v1877_v19 }
 0x189   :  { %1527 = vmatprep.subr.bf16.mxu0 %v1882_v20 }
 0x18c   :  { %1528 = vmatpush1.bf16.msra.mxu0 %v1880_v21 }
 0x18d   :  { %1529 = vmatprep.subr.bf16.mxu0 %v1885_v22 }
 0x18e   :  { %v921_v25 = vpop.f32.mrb[4].mxu1 }
 0x18f   :  { %v923_v26 = vpop.f32.mrb[5].mxu1  ;;  %v1727_v43 = vmul.f32 -1.442695, %v921_v25 }
 0x190   :  { %v925_v27 = vpop.f32.mrb[6].mxu1  ;;  %1530 = vmatpush1.bf16.msra.mxu0 %v1883_v23  ;;  %v1728_v44 = vmul.f32 -1.442695, %v923_v26 }
 0x191   :  { %v927_v29 = vpop.f32.mrb[7].mxu1  ;;  %1531 = vmatprep.subr.bf16.mxu0 %v1888_v24  ;;  %v1731_v46 = vmul.f32 -1.442695, %v925_v27  ;;  %1926 = vpow2.f32 %v1727_v43 }
 0x192   :  { %v1732_v47 = vmul.f32 -1.442695, %v927_v29  ;;  %1928 = vpow2.f32 %v1728_v44 }
 0x193   :  { %1930 = vpow2.f32 %v1731_v46 }
 0x194   :  { %1532 = vmatpush1.bf16.msra.mxu0 %v1886_v28  ;;  %1932 = vpow2.f32 %v1732_v47 }
 0x195   :  { %1533 = vmatprep.subr.bf16.mxu0 %v1891_v30 }
 0x198   :  { %1534 = vmatpush1.bf16.msra.mxu0 %v1889_v31 }
 0x199   :  { %1535 = vmatprep.subr.bf16.mxu0 %v1894_v32 }
 0x19b   :  { %v1927_v48 = vpop.eup %1926 }
 0x19c   :  { %1536 = vmatpush1.bf16.msra.mxu0 %v1892_v33  ;;  %v1929_v49 = vpop.eup %1928  ;;  %v1042_v3 = vadd.f32 1.0, %v1927_v48 }
 0x19d   :  { %1537 = vmatprep.subr.bf16.mxu0 %v1897_v34  ;;  %v1931_v50 = vpop.eup %1930  ;;  %v1043_v52 = vadd.f32 1.0, %v1929_v49 }
 0x19e   :  { %v1933_v51 = vpop.eup %1932  ;;  %v1046_v53 = vadd.f32 1.0, %v1931_v50  ;;  %1934 = vrcp.f32 %v1042_v3 }
 0x19f   :  { %v1047_v54 = vadd.f32 1.0, %v1933_v51  ;;  %1936 = vrcp.f32 %v1043_v52 }
 0x1a0   :  { %1538 = vmatpush1.bf16.msra.mxu0 %v1895_v35  ;;  %1938 = vrcp.f32 %v1046_v53 }
 0x1a1   :  { %1539 = vmatprep.subr.bf16.mxu0 %v1900_v36  ;;  %1940 = vrcp.f32 %v1047_v54 }
 0x1a4   :  { %1540 = vmatpush1.bf16.msra.mxu0 %v1898_v37 }
 0x1a5   :  { %1541 = vmatprep.subr.bf16.mxu0 %v1903_v38 }
 0x1a8   :  { %1542 = vmatpush1.bf16.msra.mxu0 %v1901_v39  ;;  %v1935_v55 = vpop.eup %1934 }
 0x1a9   :  { %1543 = vmatprep.subr.bf16.mxu0 %v1906_v40  ;;  %v1937_v56 = vpop.eup %1936  ;;  %v1066_v59 = vmul.f32 %v1935_v55, %v921_v25 }
 0x1aa   :  { %v1939_v57 = vpop.eup %1938  ;;  %v1067_v60 = vmul.f32 %v1937_v56, %v923_v26 }
 0x1ab   :  { %v1941_v58 = vpop.eup %1940  ;;  %v1070_v62 = vmul.f32 %v1939_v57, %v925_v27 }
 0x1ac   :  { %1544 = vmatpush1.bf16.msra.mxu0 %v1904_v41  ;;  %v1071_v1 = vmul.f32 %v1941_v58, %v927_v29 }
 0x1ad   :  { %1545 = vmatprep.subr.bf16.mxu0 %v1909_v42 }
 0x1b0   :  { %1546 = vmatpush1.bf16.msra.mxu0 %v1907_v45 }
 0x1ce   :  { %v1007_v61 = vpop.f32.mrb[8].mxu1 }
 0x1cf   :  { %v1074_v63 = vmul.f32 %v1066_v59, %v1007_v61  ;;  %v1009_v0 = vpop.f32.mrb[9].mxu1 }
 0x1d0   :  { %v1075_v2 = vmul.f32 %v1067_v60, %v1009_v0  ;;  %v1011_v4 = vpop.f32.mrb[10].mxu1 }
 0x1d1   :  { %v1078_v5 = vmul.f32 %v1070_v62, %v1011_v4  ;;  %v1013_v6 = vpop.f32.mrb[11].mxu1 }
 0x1d2   :  { %v1079_v7 = vmul.f32 %v1071_v1, %v1013_v6 }
 0x1d3   :  { %v1086_v8 = vpack.c.bf16 %v1078_v5, %v1074_v63 }
 0x1d4   :  { %v1087_v9 = vpack.c.bf16 %v1079_v7, %v1075_v2 }
 0x1d6   :  { %1547 = vmatprep.mubr.bf16.mxu0 %v1087_v9 }
 0x1d7   :  { %1548 = vmatmul.mubr.bf16.vlgmr.msra.gmra.mrb[4].mxu0 %v1086_v8 }
 0x2aa   :  { %v1549_v10 = vpop.f32.mrb[4].mxu0 }
 0x2ab   :  { %1573 = vst [vmem:[#allocation9] sm:$0xff] %v1549_v10  ;;  %v1551_v11 = vpop.f32.mrb[5].mxu0 }
 0x2ac   :  { %1574 = vst [vmem:[#allocation9 + $0x8] sm:$0xff] %v1551_v11  ;;  %v1553_v12 = vpop.f32.mrb[6].mxu0 }
 0x2ad   :  { %1575 = vst [vmem:[#allocation9 + $0x10] sm:$0xff] %v1553_v12  ;;  %v1555_v13 = vpop.f32.mrb[7].mxu0 }
 0x2ae   :  { %1576 = vst [vmem:[#allocation9 + $0x18] sm:$0xff] %v1555_v13 }
 0x2af   :  { %2019 = shalt.err (!%p2016_p0)
}
 0x2b0   :  { %s2020_s27 = scalar_lea.hbm %s2129_s3, 512 }
 0x2b1   :  { %p2021_p1 = scmp.ne.s32.totalorder %s2129_s3, %s2020_s27  ;;  %p2024_p2 = scmp.lt.u32.totalorder %s2020_s27, %s2129_s3 }
 0x2b3   :  { %p2026_p3 = pnand %p2024_p2, %p2021_p1 }
 0x2b5   :  { %2029 = shalt.err (!%p2026_p3)
}
 0x2b6   :  { %s2044_s5 = smov 256   ;;  %s2045_s6 = smov 16  }
 0x2b7   :  { %1588 = dma.vmem_to_hbm [thread:$0]  %s1583_s23, 512, %s2129_s3, [#allocation5], %s2044_s5, %s2044_s5, %s2045_s6  }
 0x2b8   :  { %2034 = dma.done.wait [#allocation5], 512  }
 0x2b9   :  { %2035 = vsyncadd [#allocation5], 4294966784 }
 0x2ba   :  { %1592 = vsyncpa [#allocation4], 1 }
 0x2bb   :  { %1593 = vsyncpa [#allocation7], 1 }
 0x2bc   :  { %1594 = vsyncpa [#allocation5], 1 }

</bundles_post_ra>
